<compile_context>
chip_gen: v6e
topology: v6e:2x2x1
jax: 0.10.0
libtpu: 0.0.40
codegen_flags: <defaults>
</compile_context>

<pallas_src>
import functools

import jax
import jax.numpy as jnp
from jax import lax
from jax.experimental import pallas as pl
from jax.experimental.pallas import tpu as pltpu


# ----------------------------------------------------------------------------- kernel

def _bottleneck_gumbel_kernel(x_ref, w1_ref, b1_ref, wdw_ref, b2_ref,
                              mask9_ref, w3_ref, b3_ref, *rest,
                              W, stride, use_residual):
    if stride > 1:
        sel_ref, o_ref = rest
    else:
        (o_ref,) = rest

    x = x_ref[...]                                          # (Cin, L) f32, L = bblk*H*W
    L = x.shape[1]

    # ---- conv1 (1x1 expand) + folded BN + relu6 --------------------------------------
    # flattened spatial (and folded batch) on the MXU N / lane axis -> lane-dense result.
    m = jnp.dot(w1_ref[...], x, preferred_element_type=jnp.float32)
    m = jnp.clip(m + b1_ref[...], 0.0, 6.0)                 # (Cmid, L)
    # (first gumbel mid-channel mask is folded into the depthwise weights)

    # ---- depthwise 3x3, pad=1, computed dense (stride applied later) -----------------
    # 9 static lane rotations (XLU) x precomputed per-tap 0/1 boundary masks; the masks
    # also zero any roll wrap across image boundaries of the folded batch.
    wdw = wdw_ref[...]                                      # (Cmid, 9)  BN s2 * mask folded
    mask9 = mask9_ref[...]                                  # (9, L)
    acc = None
    for dy in range(3):
        for dx in range(3):
            t = dy * 3 + dx
            shift = (-((dy - 1) * W + (dx - 1))) % L        # static, non-negative
            win = pltpu.roll(m, shift, axis=1) if shift else m
            term = wdw[:, t:t + 1] * (win * mask9[t:t + 1, :])
            acc = term if acc is None else acc + term       # init from first tap
    a = jnp.clip(acc + b2_ref[...], 0.0, 6.0)               # (Cmid, L)
    # (second gumbel mid-channel mask is folded into the w3 columns)

    # ---- conv3 (1x1 project) + folded BN + folded out-channel gumbel mask ------------
    # Projection BEFORE the spatial stride selection (Cout < Cmid -> smaller sel matmul).
    out = jnp.dot(w3_ref[...], a, preferred_element_type=jnp.float32)   # (Cout, L)
    if stride > 1:
        # spatial downsample via one block-diagonal 0/1 selection matmul on the MXU
        out = jnp.dot(out, sel_ref[...].astype(jnp.float32),
                      preferred_element_type=jnp.float32)               # (Cout, Lo)
    out = out + b3_ref[...]
    if use_residual:
        out = out + x
    o_ref[...] = out.astype(o_ref.dtype)


# ----------------------------------------------------------------------------- wrapper

def _fold_params(params, gumbel_weights, channel_options, expansion, Cmid, Cout):
    """Fold eval-mode BN scales and the three gumbel channel masks into weights/biases."""
    opts = jnp.asarray(channel_options, jnp.int32)
    gw = gumbel_weights.astype(jnp.float32)

    cm = jnp.arange(Cmid, dtype=jnp.int32)
    mask_mid = jnp.sum(gw[:, None] *
                       (cm[None, :] < (opts * expansion)[:, None]).astype(jnp.float32), axis=0)
    co = jnp.arange(Cout, dtype=jnp.int32)
    mask_out = jnp.sum(gw[:, None] *
                       (co[None, :] < opts[:, None]).astype(jnp.float32), axis=0)

    w1e = params["w1"] * params["s1"][:, None]                              # (Cmid, Cin)
    b1e = params["b1"][:, None]                                             # (Cmid, 1)
    wdwe = params["wdw"] * (params["s2"] * mask_mid)[:, None]               # (Cmid, 9)
    b2e = params["b2"][:, None]                                             # (Cmid, 1)
    w3e = params["w3"] * (params["s3"] * mask_out)[:, None] * mask_mid[None, :]  # (Cout, Cmid)
    b3e = (params["b3"] * mask_out)[:, None]                                # (Cout, 1)
    return w1e, b1e, wdwe, b2e, w3e, b3e


@functools.partial(jax.jit, static_argnames=("channel_options", "expansion", "stride"))
def bottleneck_gumbel_forward(x_nchw, params, gumbel_weights, *,
                              channel_options, expansion, stride):
    """x_nchw: (B, Cin, H, W) f32 -> (B, Cout, Ho, Wo) f32 (matches PyTorch semantics)."""
    x = x_nchw.astype(jnp.float32)
    B, Cin, H, W = x.shape
    Cmid = params["w1"].shape[0]
    Cout = params["w3"].shape[0]
    use_residual = (stride == 1 and Cin == Cout)
    Ho = (H + 2 - 3) // stride + 1
    Wo = (W + 2 - 3) // stride + 1
    HW, HoWo = H * W, Ho * Wo

    # Batch folding: fold `bblk` images into the lane axis so the output lane width
    # bblk*HoWo reaches >=128 (unmasked lane-dense stores, amortized per-step overhead)
    # while keeping the grid as large as possible for megacore sharding.
    bblk = 1
    while bblk < B and B % (2 * bblk) == 0 and bblk * HoWo < 128:
        bblk *= 2
    grid_b = B // bblk
    L, Lo = bblk * HW, bblk * HoWo

    w1e, b1e, wdwe, b2e, w3e, b3e = _fold_params(
        params, gumbel_weights, channel_options, expansion, Cmid, Cout)

    # Per-tap (dy,dx) combined 0/1 boundary masks for the roll-based depthwise conv,
    # tiled over the bblk images folded into the lane axis.
    yy = jnp.arange(HW, dtype=jnp.int32) // W
    xx = jnp.arange(HW, dtype=jnp.int32) % W
    rows = []
    for dy in range(3):
        for dx in range(3):
            valid = ((yy + (dy - 1) >= 0) & (yy + (dy - 1) < H) &
                     (xx + (dx - 1) >= 0) & (xx + (dx - 1) < W))
            rows.append(valid.astype(jnp.float32))
    mask9 = jnp.tile(jnp.stack(rows, axis=0), (1, bblk))                # (9, L)

    # Channels-major, batch folded into lanes: (Cin, B*HW).  The transpose is wrapper-side
    # layout plumbing; everything inside the kernel is lane-dense.
    x2d = x.transpose(1, 0, 2, 3).reshape(Cin, B * HW)

    def _rep(arr):                                    # grid-invariant operand, whole array
        return pl.BlockSpec(arr.shape, lambda b: (0, 0))

    operands = [x2d, w1e, b1e, wdwe, b2e, mask9, w3e, b3e]
    in_specs = [pl.BlockSpec((Cin, L), lambda b: (0, b)),
                _rep(w1e), _rep(b1e), _rep(wdwe), _rep(b2e),
                _rep(mask9), _rep(w3e), _rep(b3e)]

    if stride > 1:
        # Block-diagonal (over the folded images) 0/1 selection matrix; bf16 (exact for
        # 0/1) halves its HBM/VMEM footprint, upcast in-kernel before the MXU dot.
        src_img = ((jnp.arange(Ho) * stride)[:, None] * W
                   + (jnp.arange(Wo) * stride)[None, :]).reshape(-1)             # (HoWo,)
        src = (jnp.arange(bblk)[:, None] * HW + src_img[None, :]).reshape(-1)    # (Lo,)
        sel = (jnp.zeros((L, Lo), jnp.float32)
               .at[src, jnp.arange(Lo)].set(1.0)).astype(jnp.bfloat16)
        operands.append(sel)
        in_specs.append(_rep(sel))

    out_specs = pl.BlockSpec((Cout, Lo), lambda b: (0, b))

    kernel = functools.partial(_bottleneck_gumbel_kernel, W=W,
                               stride=stride, use_residual=use_residual)

    # VMEM budget from actual buffer sizes (+ headroom for in-kernel f32 temporaries).
    const_bytes = sum(int(a.size) * a.dtype.itemsize for a in operands[1:])
    block_bytes = (Cin * L + Cout * Lo) * 4
    need = 2 * (block_bytes + const_bytes) + 8 * Cmid * L * 4 + (2 << 20)
    vmem_limit = int(min(max(need, 16 * 1024 * 1024), 64 * 1024 * 1024))

    flops = int(B * HW * (2 * Cin * Cmid + 27 * Cmid + 2 * Cmid * Cout)
                + (2 * Cout * L * Lo * grid_b if stride > 1 else 0))
    bytes_accessed = int(4 * (B * Cin * HW + B * Cout * HoWo) + const_bytes)

    out2d = pl.pallas_call(
        kernel,
        grid=(grid_b,),
        in_specs=in_specs,
        out_specs=out_specs,
        out_shape=jax.ShapeDtypeStruct((Cout, B * HoWo), jnp.float32),
        compiler_params=pltpu.CompilerParams(
            dimension_semantics=("parallel",),
            vmem_limit_bytes=vmem_limit),
        cost_estimate=pl.CostEstimate(flops=flops, transcendentals=0,
                                      bytes_accessed=bytes_accessed),
    )(*operands)

    return out2d.reshape(Cout, B, Ho, Wo).transpose(1, 0, 2, 3)


# ----------------------------------------------------------------------------- params / reference

def _folded_bn(key, c, eps=1e-5):
    kg, kb, km, kv = jax.random.split(key, 4)
    gamma = 1.0 + 0.1 * jax.random.normal(kg, (c,))
    beta = 0.1 * jax.random.normal(kb, (c,))
    mean = 0.1 * jax.random.normal(km, (c,))
    var = jax.random.uniform(kv, (c,), minval=0.5, maxval=1.5)
    scale = gamma / jnp.sqrt(var + eps)
    bias = beta - mean * scale
    return scale.astype(jnp.float32), bias.astype(jnp.float32)


def make_params(key, cin, cout, expansion):
    cmid = cin * expansion
    k = jax.random.split(key, 6)
    w1 = (0.2 * jax.random.normal(k[0], (cmid, cin))).astype(jnp.float32)
    s1, b1 = _folded_bn(k[1], cmid)
    wdw = (0.2 * jax.random.normal(k[2], (cmid, 9))).astype(jnp.float32)   # taps: dy*3+dx
    s2, b2 = _folded_bn(k[3], cmid)
    w3 = (0.2 * jax.random.normal(k[4], (cout, cmid))).astype(jnp.float32)
    s3, b3 = _folded_bn(k[5], cout)
    return dict(w1=w1, s1=s1, b1=b1, wdw=wdw, s2=s2, b2=b2, w3=w3, s3=s3, b3=b3)


def ref_forward(x, params, gumbel_weights, *, channel_options, expansion, stride):
    """Pure-JAX reference mirroring the PyTorch Bottleneck_gumbel (eval-mode BN)."""
    Cin = x.shape[1]
    Cmid = params["w1"].shape[0]
    Cout = params["w3"].shape[0]
    dn = ("NCHW", "OIHW", "NCHW")
    use_residual = (stride == 1 and Cin == Cout)

    def gmask(C, mult):
        m = jnp.zeros((C,), jnp.float32)
        for i, k in enumerate(channel_options):
            each = (jnp.arange(C) < k * mult).astype(jnp.float32)   # ones first, zeros after
            m = m + each * gumbel_weights[i]
        return m.reshape(1, C, 1, 1)

    y = lax.conv_general_dilated(x, params["w1"].reshape(Cmid, Cin, 1, 1),
                                 (1, 1), "VALID", dimension_numbers=dn)
    y = y * params["s1"].reshape(1, Cmid, 1, 1) + params["b1"].reshape(1, Cmid, 1, 1)
    y = jnp.clip(y, 0.0, 6.0)
    y = y * gmask(Cmid, expansion)

    y = lax.conv_general_dilated(y, params["wdw"].reshape(Cmid, 1, 3, 3),
                                 (stride, stride), ((1, 1), (1, 1)),
                                 dimension_numbers=dn, feature_group_count=Cmid)
    y = y * params["s2"].reshape(1, Cmid, 1, 1) + params["b2"].reshape(1, Cmid, 1, 1)
    y = jnp.clip(y, 0.0, 6.0)
    y = y * gmask(Cmid, expansion)

    y = lax.conv_general_dilated(y, params["w3"].reshape(Cout, Cmid, 1, 1),
                                 (1, 1), "VALID", dimension_numbers=dn)
    y = y * params["s3"].reshape(1, Cout, 1, 1) + params["b3"].reshape(1, Cout, 1, 1)
    y = y * gmask(Cout, 1)

    if use_residual:
        y = x + y
    return y


# ----------------------------------------------------------------------------- self-test

if __name__ == "__main__":
    key = jax.random.PRNGKey(0)
    B, H, W = 2, 16, 16
    configs = [
        # (in_c, out_c, expansion, stride, channel_options)
        (8, 8, 4, 1, (2, 4, 6, 8)),    # residual path   (stride=1, in == out)
        (8, 16, 4, 2, (2, 4, 6, 8)),   # downsample path (stride=2, no residual)
    ]

    for in_c, out_c, expansion, stride, channel_options in configs:
        key, kx, kp, kg = jax.random.split(key, 4)
        x = jax.random.normal(kx, (B, in_c, H, W), dtype=jnp.float32)
        params = make_params(kp, in_c, out_c, expansion)
        gumbel_weights = jax.nn.softmax(jax.random.normal(kg, (len(channel_options),)))

        out = bottleneck_gumbel_forward(x, params, gumbel_weights,
                                        channel_options=channel_options,
                                        expansion=expansion, stride=stride)
        out = jax.block_until_ready(out)

        ref = ref_forward(x, params, gumbel_weights,
                          channel_options=channel_options,
                          expansion=expansion, stride=stride)
        assert out.shape == ref.shape, (out.shape, ref.shape)
        max_err = float(jnp.max(jnp.abs(out - ref)))
        assert jnp.allclose(out, ref, atol=2e-3, rtol=2e-3), \
            f"stride={stride}: max abs err {max_err}"

    print("KERNEL_OK")
</pallas_src>

<mosaic_0001>
module attributes {stable_mosaic.version = 11 : i64} {
  func.func @_bottleneck_gumbel_kernel(%arg0: i32, %arg1: memref<8x256xf32, #tpu.memory_space<vmem>>, %arg2: memref<32x8xf32, #tpu.memory_space<vmem>>, %arg3: memref<32x1xf32, #tpu.memory_space<vmem>>, %arg4: memref<32x9xf32, #tpu.memory_space<vmem>>, %arg5: memref<32x1xf32, #tpu.memory_space<vmem>>, %arg6: memref<9x256xf32, #tpu.memory_space<vmem>>, %arg7: memref<8x32xf32, #tpu.memory_space<vmem>>, %arg8: memref<8x1xf32, #tpu.memory_space<vmem>>, %arg9: memref<8x256xf32, #tpu.memory_space<vmem>>) attributes {dimension_semantics = [#tpu.dimension_semantics<parallel>], iteration_bounds = array<i64: 2>, scalar_prefetch = 0 : i64, scratch_operands = 0 : i64, tpu.core_type = #tpu.core_type<tc>, window_params = [{transform_indices = @transform_0, window_bounds = array<i64: 8, 256>}, {pipeline_mode = #tpu.pipeline_mode<synchronous>, transform_indices = @transform_1, window_bounds = array<i64: 32, 8>}, {pipeline_mode = #tpu.pipeline_mode<synchronous>, transform_indices = @transform_2, window_bounds = array<i64: 32, 1>}, {pipeline_mode = #tpu.pipeline_mode<synchronous>, transform_indices = @transform_3, window_bounds = array<i64: 32, 9>}, {pipeline_mode = #tpu.pipeline_mode<synchronous>, transform_indices = @transform_4, window_bounds = array<i64: 32, 1>}, {pipeline_mode = #tpu.pipeline_mode<synchronous>, transform_indices = @transform_5, window_bounds = array<i64: 9, 256>}, {pipeline_mode = #tpu.pipeline_mode<synchronous>, transform_indices = @transform_6, window_bounds = array<i64: 8, 32>}, {pipeline_mode = #tpu.pipeline_mode<synchronous>, transform_indices = @transform_7, window_bounds = array<i64: 8, 1>}, {transform_indices = @transform_8, window_bounds = array<i64: 8, 256>}]} {
    %c0 = arith.constant 0 : index
    %c0_0 = arith.constant 0 : index
    %0 = vector.load %arg1[%c0, %c0_0] : memref<8x256xf32, #tpu.memory_space<vmem>>, vector<8x256xf32>
    %c0_1 = arith.constant 0 : index
    %c0_2 = arith.constant 0 : index
    %1 = vector.load %arg2[%c0_1, %c0_2] : memref<32x8xf32, #tpu.memory_space<vmem>>, vector<32x8xf32>
    %cst = arith.constant dense<0.000000e+00> : vector<32x256xf32>
    %2 = tpu.matmul %1, %0, %cst {dimension_numbers = #tpu.dot_dimension_numbers<[1], [0], [0], [1], [0, 0, 1, 1], [], []>} : vector<32x8xf32>, vector<8x256xf32>, vector<32x256xf32> -> vector<32x256xf32>
    %c0_3 = arith.constant 0 : index
    %c0_4 = arith.constant 0 : index
    %3 = vector.load %arg3[%c0_3, %c0_4] : memref<32x1xf32, #tpu.memory_space<vmem>>, vector<32x1xf32>
    %4 = vector.broadcast %3 : vector<32x1xf32> to vector<32x256xf32>
    %5 = arith.addf %2, %4 : vector<32x256xf32>
    %cst_5 = arith.constant 0.000000e+00 : f32
    %cst_6 = arith.constant 6.000000e+00 : f32
    %6 = vector.broadcast %cst_5 : f32 to vector<32x256xf32>
    %7 = arith.maximumf %6, %5 : vector<32x256xf32>
    %8 = vector.broadcast %cst_6 : f32 to vector<32x256xf32>
    %9 = arith.minimumf %8, %7 : vector<32x256xf32>
    %c0_7 = arith.constant 0 : index
    %c0_8 = arith.constant 0 : index
    %10 = vector.load %arg4[%c0_7, %c0_8] : memref<32x9xf32, #tpu.memory_space<vmem>>, vector<32x9xf32>
    %c0_9 = arith.constant 0 : index
    %c0_10 = arith.constant 0 : index
    %11 = vector.load %arg6[%c0_9, %c0_10] : memref<9x256xf32, #tpu.memory_space<vmem>>, vector<9x256xf32>
    %c17_i32 = arith.constant 17 : i32
    %12 = tpu.dynamic_rotate %9 by %c17_i32 dim 1 : vector<32x256xf32>, i32 -> vector<32x256xf32>
    %13 = vector.extract_strided_slice %10 {offsets = [0, 0], sizes = [32, 1], strides = [1, 1]} : vector<32x9xf32> to vector<32x1xf32>
    %14 = vector.extract_strided_slice %11 {offsets = [0, 0], sizes = [1, 256], strides = [1, 1]} : vector<9x256xf32> to vector<1x256xf32>
    %15 = vector.broadcast %14 : vector<1x256xf32> to vector<32x256xf32>
    %16 = arith.mulf %12, %15 : vector<32x256xf32>
    %17 = vector.broadcast %13 : vector<32x1xf32> to vector<32x256xf32>
    %18 = arith.mulf %17, %16 : vector<32x256xf32>
    %c16_i32 = arith.constant 16 : i32
    %19 = tpu.dynamic_rotate %9 by %c16_i32 dim 1 : vector<32x256xf32>, i32 -> vector<32x256xf32>
    %20 = vector.extract_strided_slice %10 {offsets = [0, 1], sizes = [32, 1], strides = [1, 1]} : vector<32x9xf32> to vector<32x1xf32>
    %21 = vector.extract_strided_slice %11 {offsets = [1, 0], sizes = [1, 256], strides = [1, 1]} : vector<9x256xf32> to vector<1x256xf32>
    %22 = vector.broadcast %21 : vector<1x256xf32> to vector<32x256xf32>
    %23 = arith.mulf %19, %22 : vector<32x256xf32>
    %24 = vector.broadcast %20 : vector<32x1xf32> to vector<32x256xf32>
    %25 = arith.mulf %24, %23 : vector<32x256xf32>
    %26 = arith.addf %18, %25 : vector<32x256xf32>
    %c15_i32 = arith.constant 15 : i32
    %27 = tpu.dynamic_rotate %9 by %c15_i32 dim 1 : vector<32x256xf32>, i32 -> vector<32x256xf32>
    %28 = vector.extract_strided_slice %10 {offsets = [0, 2], sizes = [32, 1], strides = [1, 1]} : vector<32x9xf32> to vector<32x1xf32>
    %29 = vector.extract_strided_slice %11 {offsets = [2, 0], sizes = [1, 256], strides = [1, 1]} : vector<9x256xf32> to vector<1x256xf32>
    %30 = vector.broadcast %29 : vector<1x256xf32> to vector<32x256xf32>
    %31 = arith.mulf %27, %30 : vector<32x256xf32>
    %32 = vector.broadcast %28 : vector<32x1xf32> to vector<32x256xf32>
    %33 = arith.mulf %32, %31 : vector<32x256xf32>
    %34 = arith.addf %26, %33 : vector<32x256xf32>
    %c1_i32 = arith.constant 1 : i32
    %35 = tpu.dynamic_rotate %9 by %c1_i32 dim 1 : vector<32x256xf32>, i32 -> vector<32x256xf32>
    %36 = vector.extract_strided_slice %10 {offsets = [0, 3], sizes = [32, 1], strides = [1, 1]} : vector<32x9xf32> to vector<32x1xf32>
    %37 = vector.extract_strided_slice %11 {offsets = [3, 0], sizes = [1, 256], strides = [1, 1]} : vector<9x256xf32> to vector<1x256xf32>
    %38 = vector.broadcast %37 : vector<1x256xf32> to vector<32x256xf32>
    %39 = arith.mulf %35, %38 : vector<32x256xf32>
    %40 = vector.broadcast %36 : vector<32x1xf32> to vector<32x256xf32>
    %41 = arith.mulf %40, %39 : vector<32x256xf32>
    %42 = arith.addf %34, %41 : vector<32x256xf32>
    %43 = vector.extract_strided_slice %10 {offsets = [0, 4], sizes = [32, 1], strides = [1, 1]} : vector<32x9xf32> to vector<32x1xf32>
    %44 = vector.extract_strided_slice %11 {offsets = [4, 0], sizes = [1, 256], strides = [1, 1]} : vector<9x256xf32> to vector<1x256xf32>
    %45 = vector.broadcast %44 : vector<1x256xf32> to vector<32x256xf32>
    %46 = arith.mulf %9, %45 : vector<32x256xf32>
    %47 = vector.broadcast %43 : vector<32x1xf32> to vector<32x256xf32>
    %48 = arith.mulf %47, %46 : vector<32x256xf32>
    %49 = arith.addf %42, %48 : vector<32x256xf32>
    %c255_i32 = arith.constant 255 : i32
    %50 = tpu.dynamic_rotate %9 by %c255_i32 dim 1 : vector<32x256xf32>, i32 -> vector<32x256xf32>
    %51 = vector.extract_strided_slice %10 {offsets = [0, 5], sizes = [32, 1], strides = [1, 1]} : vector<32x9xf32> to vector<32x1xf32>
    %52 = vector.extract_strided_slice %11 {offsets = [5, 0], sizes = [1, 256], strides = [1, 1]} : vector<9x256xf32> to vector<1x256xf32>
    %53 = vector.broadcast %52 : vector<1x256xf32> to vector<32x256xf32>
    %54 = arith.mulf %50, %53 : vector<32x256xf32>
    %55 = vector.broadcast %51 : vector<32x1xf32> to vector<32x256xf32>
    %56 = arith.mulf %55, %54 : vector<32x256xf32>
    %57 = arith.addf %49, %56 : vector<32x256xf32>
    %c241_i32 = arith.constant 241 : i32
    %58 = tpu.dynamic_rotate %9 by %c241_i32 dim 1 : vector<32x256xf32>, i32 -> vector<32x256xf32>
    %59 = vector.extract_strided_slice %10 {offsets = [0, 6], sizes = [32, 1], strides = [1, 1]} : vector<32x9xf32> to vector<32x1xf32>
    %60 = vector.extract_strided_slice %11 {offsets = [6, 0], sizes = [1, 256], strides = [1, 1]} : vector<9x256xf32> to vector<1x256xf32>
    %61 = vector.broadcast %60 : vector<1x256xf32> to vector<32x256xf32>
    %62 = arith.mulf %58, %61 : vector<32x256xf32>
    %63 = vector.broadcast %59 : vector<32x1xf32> to vector<32x256xf32>
    %64 = arith.mulf %63, %62 : vector<32x256xf32>
    %65 = arith.addf %57, %64 : vector<32x256xf32>
    %c240_i32 = arith.constant 240 : i32
    %66 = tpu.dynamic_rotate %9 by %c240_i32 dim 1 : vector<32x256xf32>, i32 -> vector<32x256xf32>
    %67 = vector.extract_strided_slice %10 {offsets = [0, 7], sizes = [32, 1], strides = [1, 1]} : vector<32x9xf32> to vector<32x1xf32>
    %68 = vector.extract_strided_slice %11 {offsets = [7, 0], sizes = [1, 256], strides = [1, 1]} : vector<9x256xf32> to vector<1x256xf32>
    %69 = vector.broadcast %68 : vector<1x256xf32> to vector<32x256xf32>
    %70 = arith.mulf %66, %69 : vector<32x256xf32>
    %71 = vector.broadcast %67 : vector<32x1xf32> to vector<32x256xf32>
    %72 = arith.mulf %71, %70 : vector<32x256xf32>
    %73 = arith.addf %65, %72 : vector<32x256xf32>
    %c239_i32 = arith.constant 239 : i32
    %74 = tpu.dynamic_rotate %9 by %c239_i32 dim 1 : vector<32x256xf32>, i32 -> vector<32x256xf32>
    %75 = vector.extract_strided_slice %10 {offsets = [0, 8], sizes = [32, 1], strides = [1, 1]} : vector<32x9xf32> to vector<32x1xf32>
    %76 = vector.extract_strided_slice %11 {offsets = [8, 0], sizes = [1, 256], strides = [1, 1]} : vector<9x256xf32> to vector<1x256xf32>
    %77 = vector.broadcast %76 : vector<1x256xf32> to vector<32x256xf32>
    %78 = arith.mulf %74, %77 : vector<32x256xf32>
    %79 = vector.broadcast %75 : vector<32x1xf32> to vector<32x256xf32>
    %80 = arith.mulf %79, %78 : vector<32x256xf32>
    %81 = arith.addf %73, %80 : vector<32x256xf32>
    %c0_11 = arith.constant 0 : index
    %c0_12 = arith.constant 0 : index
    %82 = vector.load %arg5[%c0_11, %c0_12] : memref<32x1xf32, #tpu.memory_space<vmem>>, vector<32x1xf32>
    %83 = vector.broadcast %82 : vector<32x1xf32> to vector<32x256xf32>
    %84 = arith.addf %81, %83 : vector<32x256xf32>
    %cst_13 = arith.constant 0.000000e+00 : f32
    %cst_14 = arith.constant 6.000000e+00 : f32
    %85 = vector.broadcast %cst_13 : f32 to vector<32x256xf32>
    %86 = arith.maximumf %85, %84 : vector<32x256xf32>
    %87 = vector.broadcast %cst_14 : f32 to vector<32x256xf32>
    %88 = arith.minimumf %87, %86 : vector<32x256xf32>
    %c0_15 = arith.constant 0 : index
    %c0_16 = arith.constant 0 : index
    %89 = vector.load %arg7[%c0_15, %c0_16] : memref<8x32xf32, #tpu.memory_space<vmem>>, vector<8x32xf32>
    %cst_17 = arith.constant dense<0.000000e+00> : vector<8x256xf32>
    %90 = tpu.matmul %89, %88, %cst_17 {dimension_numbers = #tpu.dot_dimension_numbers<[1], [0], [0], [1], [0, 0, 1, 1], [], []>} : vector<8x32xf32>, vector<32x256xf32>, vector<8x256xf32> -> vector<8x256xf32>
    %c0_18 = arith.constant 0 : index
    %c0_19 = arith.constant 0 : index
    %91 = vector.load %arg8[%c0_18, %c0_19] : memref<8x1xf32, #tpu.memory_space<vmem>>, vector<8x1xf32>
    %92 = vector.broadcast %91 : vector<8x1xf32> to vector<8x256xf32>
    %93 = arith.addf %90, %92 : vector<8x256xf32>
    %94 = arith.addf %93, %0 : vector<8x256xf32>
    %c0_20 = arith.constant 0 : index
    %c0_21 = arith.constant 0 : index
    %95 = vector.load %arg9[%c0_20, %c0_21] : memref<8x256xf32, #tpu.memory_space<vmem>>, vector<8x256xf32>
    tpu.vector_store %arg9[%c0_20, %c0_21], %94 {strides = array<i32>} : memref<8x256xf32, #tpu.memory_space<vmem>>, vector<8x256xf32>,
    return
  }
  func.func @transform_0(%arg0: i32) -> (i32, i32) {
    %c0_i32 = arith.constant 0 : i32
    %c0_i32_0 = arith.constant 0 : i32
    return %c0_i32, %arg0 : i32, i32
  }
  func.func @transform_1(%arg0: i32) -> (i32, i32) {
    %c0_i32 = arith.constant 0 : i32
    %c0_i32_0 = arith.constant 0 : i32
    %c0_i32_1 = arith.constant 0 : i32
    return %c0_i32, %c0_i32_0 : i32, i32
  }
  func.func @transform_2(%arg0: i32) -> (i32, i32) {
    %c0_i32 = arith.constant 0 : i32
    %c0_i32_0 = arith.constant 0 : i32
    %c0_i32_1 = arith.constant 0 : i32
    return %c0_i32, %c0_i32_0 : i32, i32
  }
  func.func @transform_3(%arg0: i32) -> (i32, i32) {
    %c0_i32 = arith.constant 0 : i32
    %c0_i32_0 = arith.constant 0 : i32
    %c0_i32_1 = arith.constant 0 : i32
    return %c0_i32, %c0_i32_0 : i32, i32
  }
  func.func @transform_4(%arg0: i32) -> (i32, i32) {
    %c0_i32 = arith.constant 0 : i32
    %c0_i32_0 = arith.constant 0 : i32
    %c0_i32_1 = arith.constant 0 : i32
    return %c0_i32, %c0_i32_0 : i32, i32
  }
  func.func @transform_5(%arg0: i32) -> (i32, i32) {
    %c0_i32 = arith.constant 0 : i32
    %c0_i32_0 = arith.constant 0 : i32
    %c0_i32_1 = arith.constant 0 : i32
    return %c0_i32, %c0_i32_0 : i32, i32
  }
  func.func @transform_6(%arg0: i32) -> (i32, i32) {
    %c0_i32 = arith.constant 0 : i32
    %c0_i32_0 = arith.constant 0 : i32
    %c0_i32_1 = arith.constant 0 : i32
    return %c0_i32, %c0_i32_0 : i32, i32
  }
  func.func @transform_7(%arg0: i32) -> (i32, i32) {
    %c0_i32 = arith.constant 0 : i32
    %c0_i32_0 = arith.constant 0 : i32
    %c0_i32_1 = arith.constant 0 : i32
    return %c0_i32, %c0_i32_0 : i32, i32
  }
  func.func @transform_8(%arg0: i32) -> (i32, i32) {
    %c0_i32 = arith.constant 0 : i32
    %c0_i32_0 = arith.constant 0 : i32
    return %c0_i32, %arg0 : i32, i32
  }
}

</mosaic_0001>

<bundles_post_ra>
// kernel: mul.39
= control target key start
LH: loop header
LB: loop body
LE: loop exit
PB: predicated region body
PF: predicated region fallthrough
CT: control target
= control target key end

     0   :  { %s34_s0 = inlined_call_operand.vmem [shape: f32[32], index: 0, kind: input, shape index: {}]   ;;  %s35_s1 = inlined_call_operand.vmem [shape: f32[32], index: 1, kind: input, shape index: {}]   ;;  %s36_s2 = inlined_call_operand.vmem [shape: f32[32], index: 2, kind: output, shape index: {}]  }
   0x1   :  { %v3_v0 = vld [vmem:[%s34_s0] sm:$0x1] }
   0x2   :  { %v4_v1 = vld [vmem:[%s35_s1] sm:$0x1] }
   0x3   :  { %v7_v2 = vmul.f32 %v4_v1, %v3_v0 }
   0x5   :  { %9 = vst [vmem:[%s36_s2] sm:$0x1] %v7_v2 }

// kernel: bottleneck_gumbel_forward.1
= control target key start
LH: loop header
LB: loop body
LE: loop exit
PB: predicated region body
PF: predicated region fallthrough
CT: control target
= control target key end

     0   :  { %s1426_s27 = smov 0   ;;  %s2192_s0 = inlined_call_operand.vmem [shape: f32[8,512], index: 0, kind: input, shape index: {}]   ;;  %s2193_s1 = inlined_call_operand.vmem [shape: f32[32,8], index: 1, kind: input, shape index: {}]   ;;  %s2194_s2 = inlined_call_operand.vmem [shape: f32[32,1], index: 2, kind: input, shape index: {}]   ;;  %s2195_s3 = inlined_call_operand.vmem [shape: f32[32,9], index: 3, kind: input, shape index: {}]   ;;  %s2196_s4 = inlined_call_operand.vmem [shape: f32[32,1], index: 4, kind: input, shape index: {}]   ;;  %s2197_s5 = inlined_call_operand.vmem [shape: f32[9,256], index: 5, kind: input, shape index: {}]   ;;  %s2198_s6 = inlined_call_operand.vmem [shape: f32[8,32], index: 6, kind: input, shape index: {}]   ;;  %s2199_s7 = inlined_call_operand.vmem [shape: f32[8,1], index: 7, kind: input, shape index: {}]   ;;  %s2200_s8 = inlined_call_operand.vmem [shape: f32[8,512], index: 8, kind: output, shape index: {}]  }
   0x1 LB: > { %s1285_s28 = sadd.s32 4294967295, %s1361_s27   ;;  %p1289_p0 = scmp.ge.s32.totalorder %s1361_s27, 1  ;;  %s1361_s27 = sphi %s1426_s27, %s18_s27  }
   0x2   : > { %p263_p1 = scmp.lt.s32.totalorder %s1361_s27, 3 }
   0x4   : > { %p264_p2 = pnand %p1289_p0, %p263_p1 }
   0x6   : > { %267 = sbr.rel (%p264_p2) target bundleno = 750 (0x2ee), region = 52 }
   0xb   : > { %s1290_s29 = sshll.u32 %s1285_s28, 1  ;;  %v1363_v0 = vmov 0.0   ;;  %v2201_v1 = vmov 0   ;;  %v318_v2 = vld [vmem:[%s2194_s2 + $0x18] sm:$0xff]  ;;  %v317_v3 = vld [vmem:[%s2194_s2 + $0x10] sm:$0xff]  ;;  %v316_v4 = vld [vmem:[%s2194_s2 + $0x8] sm:$0xff] }
   0xc   : > { %p298_p3 = scmp.lt.s32.totalorder %s1290_s29, 3  ;;  %416 = vmatprep.mubr.f32.mxu0 %v1363_v0  ;;  %1329 = vset.pattern.permute.xlu0 %v2201_v1  ;;  %v315_v5 = vld [vmem:[%s2194_s2] sm:$0xff]  ;;  %vm339_vm0 = vcmask 64512   ;;  %v1466_v9 = vld [vmem:[%s2195_s3 + $0x18] sm:$0xff]  ;;  %v312_v10 = vld [vmem:[%s2193_s1 + $0x8] sm:$0xff]  ;;  %v1365_v12 = vmov 1  }
   0xd   : > { %336 = vperm.xlu0 %1329, %v318_v2   ;;  %1330 = vset.pattern.permute.xlu1 %v2201_v1  ;;  %v311_v6 = vld [vmem:[%s2193_s1] sm:$0xff]  ;;  %v1476_v11 = vld [vmem:[%s2195_s3 + $0x10] sm:$0xff]  ;;  %v1484_v13 = vld [vmem:[%s2195_s3 + $0x8] sm:$0xff]  ;;  %v1366_v16 = vmov 3   ;;  %v1367_v18 = vmov 2   ;;  %v1368_v19 = vmov 4  }
   0xe   : > { %s2248_s29 = smov (!%p298_p3, %s1290_s29), 3  ;;  %1218 = vmatprep.mubr.f32.mxu1 %v1363_v0  ;;  %326 = vperm.xlu1 %1330, %v316_v4   ;;  %v313_v14 = vld [vmem:[%s2193_s1 + $0x10] sm:$0xff]  ;;  %v314_v15 = vld [vmem:[%s2193_s1 + $0x18] sm:$0xff]  ;;  %v1501_v17 = vld [vmem:[%s2195_s3] sm:$0xff]  ;;  %v1369_v20 = vmov 5   ;;  %v1370_v21 = vmov 7  }
   0xf   : > { %s1291_s14 = sshll.u32 %s2248_s29, 3  ;;  %v1371_v22 = vmov 6   ;;  %v2202_v23 = vmov 8   ;;  %s1373_s17 = smov 17   ;;  %vm1150_vm9 = vcmask 261120  }
  0x10   : > { %s1456_s19 = scalar_lea.vmem %s2192_s0, %s1291_s14  ;;  %s1374_s18 = smov 16  }
  0x11   : > { %331 = vperm.xlu0 %1329, %v317_v3   ;;  %v310_v7 = vld [vmem:[%s1456_s19 + $0x8] sm:$0xff]  ;;  %v309_v8 = vld [vmem:[%s1456_s19] sm:$0xff]  ;;  %s1375_s20 = smov 15   ;;  %s1376_s21 = smov 1  }
  0x12   : > { %382 = vmatprep.subr.mxu0 %v310_v7  ;;  %321 = vperm.xlu1 %1330, %v315_v5   ;;  %s1377_s22 = smov 127   ;;  %s1378_s23 = smov 113  }
  0x13   : > { %383 = vmatpush1.msra.mxu0 %v309_v8  ;;  %s1379_s24 = smov 112   ;;  %s1380_s25 = smov 111  }
  0x14   : > { %1294 = vmatmul.mubr.msk.f32.vlgmr.msra.gmra.mxu0 %vm339_vm0, %v311_v6  ;;  %s307_s10 = scalar_lea.vmem %s2200_s8, %s1291_s14 }
  0x15   : > { %525 = vperm.xlu0 %1329, %v1466_v9   ;;  %422 = vmatprep.mubr.f32.mxu0 %v1363_v0 }
  0x16   : > { %1331 = vset.pattern.permute.xlu1 %v1365_v12 }
  0x17   : > { %590 = vperm.xlu1 %1331, %v1466_v9  }
  0x18   : > { %1295 = vmatmul.mubr.msk.f32.gmra.mxu0 %vm339_vm0, %v312_v10 }
  0x19   : > { %520 = vperm.xlu0 %1329, %v1476_v11   ;;  %428 = vmatprep.mubr.f32.mxu0 %v1363_v0 }
  0x1b   : > { %586 = vperm.xlu1 %1331, %v1476_v11  }
  0x1c   : > { %1296 = vmatmul.mubr.msk.f32.gmra.mxu0 %vm339_vm0, %v313_v14 }
  0x1d   : > { %515 = vperm.xlu0 %1329, %v1484_v13   ;;  %434 = vmatprep.mubr.f32.mxu0 %v1363_v0 }
  0x1f   : > { %1333 = vset.pattern.permute.xlu1 %v1366_v16 }
  0x20   : > { %1297 = vmatmul.mubr.msk.f32.gmra.mxu0 %vm339_vm0, %v314_v15  ;;  %736 = vperm.xlu1 %1333, %v1466_v9   ;;  %v1097_v15 = vld [vmem:[%s2196_s4 + $0x10] sm:$0xff] }
  0x21   : > { %1332 = vset.pattern.permute.xlu0 %v1365_v12 }
  0x22   : > { %582 = vperm.xlu0 %1332, %v1484_v13  }
  0x24   : > { %1334 = vset.pattern.permute.xlu1 %v2201_v1 }
  0x25   : > { %510 = vperm.xlu1 %1334, %v1501_v17  }
  0x26   : > { %578 = vperm.xlu0 %1332, %v1501_v17  }
  0x29   : > { %1337 = vset.pattern.permute.xlu1 %v1368_v19 }
  0x2a   : > { %1335 = vset.pattern.permute.xlu0 %v1367_v18  ;;  %784 = vperm.xlu1 %1337, %v1466_v9  }
  0x2b   : > { %663 = vperm.xlu0 %1335, %v1466_v9  }
  0x2e   : > { %1338 = vset.pattern.permute.xlu1 %v1367_v18  ;;  %v1096_v18 = vld [vmem:[%s2196_s4 + $0x8] sm:$0xff] }
  0x2f   : > { %659 = vperm.xlu0 %1335, %v1476_v11   ;;  %651 = vperm.xlu1 %1338, %v1501_v17  }
  0x33   : > { %655 = vperm.xlu0 %1335, %v1484_v13   ;;  %1339 = vset.pattern.permute.xlu1 %v1368_v19 }
  0x34   : > { %780 = vperm.xlu1 %1339, %v1476_v11  }
  0x37   : > { %1336 = vset.pattern.permute.xlu0 %v1366_v16 }
  0x38   : > { %732 = vperm.xlu0 %1336, %v1476_v11   ;;  %776 = vperm.xlu1 %1339, %v1484_v13  }
  0x3c   : > { %728 = vperm.xlu0 %1336, %v1484_v13   ;;  %1340 = vset.pattern.permute.xlu1 %v1369_v20 }
  0x3d   : > { %853 = vperm.xlu1 %1340, %v1476_v11  }
  0x40   : > { %724 = vperm.xlu0 %1336, %v1501_v17  }
  0x41   : > { %1344 = vset.pattern.permute.xlu1 %v1370_v21 }
  0x42   : > { %1003 = vperm.xlu1 %1344, %v1466_v9  }
  0x44   : > { %1341 = vset.pattern.permute.xlu0 %v1368_v19 }
  0x45   : > { %772 = vperm.xlu0 %1341, %v1501_v17  }
  0x46   : > { %1345 = vset.pattern.permute.xlu1 %v1369_v20 }
  0x47   : > { %845 = vperm.xlu1 %1345, %v1501_v17  }
  0x49   : > { %1342 = vset.pattern.permute.xlu0 %v1369_v20 }
  0x4a   : > { %857 = vperm.xlu0 %1342, %v1466_v9  }
  0x4b   : > { %1346 = vset.pattern.permute.xlu1 %v1370_v21 }
  0x4c   : > { %999 = vperm.xlu1 %1346, %v1476_v11  }
  0x4e   : > { %849 = vperm.xlu0 %1342, %v1484_v13  }
  0x50   : > { %1349 = vset.pattern.permute.xlu1 %v2201_v1 }
  0x52   : > { %1343 = vset.pattern.permute.xlu0 %v1371_v22  ;;  %v1144_v22 = vld [vmem:[%s2199_s7] sm:$0xff] }
  0x53   : > { %930 = vperm.xlu0 %1343, %v1466_v9  }
  0x57   : > { %926 = vperm.xlu0 %1343, %v1476_v11  }
  0x5b   : > { %922 = vperm.xlu0 %1343, %v1484_v13  }
  0x5f   : > { %918 = vperm.xlu0 %1343, %v1501_v17  }
  0x63   : > { %1347 = vset.pattern.permute.xlu0 %v1370_v21 }
  0x64   : > { %995 = vperm.xlu0 %1347, %v1484_v13  }
  0x68   : > { %991 = vperm.xlu0 %1347, %v1501_v17  }
  0x6c   : > { %1348 = vset.pattern.permute.xlu0 %v2202_v23 }
  0x6d   : > { %1076 = vperm.xlu0 %1348, %v1466_v9  }
  0x88   : > { %v1532_v24 = vpop.permute.xlu0 %336 }
  0x89   : > { %v327_v26 = vpop.permute.xlu1 %326 }
  0x8c   : > { %v1534_v25 = vpop.permute.xlu0 %331 }
  0x8d   : > { %v322_v28 = vpop.permute.xlu1 %321 }
  0x90   : > { %v1536_v27 = vpop.permute.xlu0 %525 }
  0x91   : > { %2217 = vst [vmem:[#allocation2_spill] sm:$0xff] %v1536_v27 }
  0x92   : > { %v1613_v2 = vpop.permute.xlu1 %590 }
  0x93   : > { %2220 = vst [vmem:[#allocation5_spill] sm:$0xff] %v1613_v2 }
  0x94   : > { %v1538_v35 = vpop.permute.xlu0 %520 }
  0x96   : > { %v1625_v5 = vpop.permute.xlu1 %586 }
  0x98   : > { %v1548_v40 = vpop.permute.xlu0 %515 }
  0x9b   : > { %v1635_v7 = vpop.permute.xlu1 %736 }
  0x9c   : > { %2221 = vst [vmem:[#allocation6_spill] sm:$0xff] %v1635_v7 }
  0x9d   : > { %v1558_v43 = vpop.permute.xlu0 %582 }
  0xa0   : > { %v1645_v9 = vpop.permute.xlu1 %510 }
  0xa1   : > { %v1566_v45 = vpop.permute.xlu0 %578 }
  0xa5   : > { %v1653_v12 = vpop.permute.xlu1 %784 }
  0xa6   : > { %v1574_v48 = vpop.permute.xlu0 %663  ;;  %2223 = vst [vmem:[#allocation8_spill] sm:$0xff] %v1653_v12 }
  0xa7   : > { %2218 = vst [vmem:[#allocation3_spill] sm:$0xff] %v1574_v48 }
  0xaa   : > { %v1585_v53 = vpop.permute.xlu0 %659 }
  0xae   : > { %v1593_v56 = vpop.permute.xlu0 %655 }
  0xb3   : > { %v1605_v62 = vpop.permute.xlu0 %732 }
  0xb7   : > { %v1617_v3 = vpop.permute.xlu0 %728 }
  0xbb   : > { %v1629_v6 = vpop.permute.xlu0 %724 }
  0xc0   : > { %v1639_v8 = vpop.permute.xlu0 %772 }
  0xc5   : > { %v1648_v10 = vpop.permute.xlu0 %857 }
  0xc6   : > { %2222 = vst [vmem:[#allocation7_spill] sm:$0xff] %v1648_v10 }
  0xc9   : > { %v1657_v14 = vpop.permute.xlu0 %849 }
  0xd4   : > { %v418_v29 = vpop.f32.mrf.mxu0 }
  0xd5   : > { %v419_v30 = vadd.f32 %v418_v29, %v322_v28 }
  0xd6   : > { %v420_v31 = vpop.f32.mrf.mxu0 }
  0xd7   : > { %v441_v32 = vmax.f32 %v419_v30, 0.0  ;;  %v421_v33 = vadd.f32 %v420_v31, %v322_v28 }
  0xd8   : > { %v424_v34 = vpop.f32.mrf.mxu0 }
  0xd9   : > { %v1540_v36 = vmin.f32 %v441_v32, 6.0  ;;  %v442_v37 = vmax.f32 %v421_v33, 0.0  ;;  %v425_v39 = vadd.f32 %v424_v34, %v327_v26  ;;  %v481_v34 = vlaneseq }
  0xda   : > { %v426_v44 = vpop.f32.mrf.mxu0 }
  0xdb   : > { %v1542_v38 = vmin.f32 %v442_v37, 6.0  ;;  %465 = vrot.lane.b32.xlu1 %v1540_v36, %s1373_s17  ;;  %v443_v41 = vmax.f32 %v425_v39, 0.0  ;;  %v427_v46 = vadd.f32 %v426_v44, %v327_v26  ;;  %v1722_v39 = vshrl.u32 %v481_v34, 7 }
  0xdc   : > { %v430_v49 = vpop.f32.mrf.mxu0  ;;  %v1726_v44 = vand.u32 127, %v481_v34 }
  0xdd   : > { %473 = vrot.lane.b32.xlu0 %v1542_v38, %s1373_s17  ;;  %v1554_v42 = vmin.f32 %v443_v41, 6.0  ;;  %v444_v47 = vmax.f32 %v427_v46, 0.0  ;;  %v431_v51 = vadd.f32 %v430_v49, %v1534_v25  ;;  %v494_v46 = vsub.s32 0, %v1722_v39 }
  0xde   : > { %v432_v52 = vpop.f32.mrf.mxu0  ;;  %vm483_vm1 = vcmp.lt.s32.totalorder %v1726_v44, 17  ;;  %v563_v49 = vsub.s32 1, %v1722_v39  ;;  %vm552_vm2 = vcmp.lt.s32.totalorder %v1726_v44, 16  ;;  %vm625_vm3 = vcmp.lt.s32.totalorder %v1726_v44, 15 }
  0xdf   : > { %536 = vrot.lane.b32.xlu1 %v1540_v36, %s1374_s18  ;;  %v1578_v50 = vmin.f32 %v444_v47, 6.0  ;;  %v445_v54 = vmax.f32 %v431_v51, 0.0  ;;  %v433_v16 = vadd.f32 %v432_v52, %v1534_v25  ;;  %v1736_v51 = vld [vmem:[%s2197_s5] sm:$0xff]  ;;  %v1741_v52 = vld [vmem:[%s2197_s5 + $0x8] sm:$0xff]  ;;  %vm698_vm4 = vcmp.lt.s32.totalorder %v1726_v44, 1 }
  0xe0   : > { %v436_v55 = vpop.f32.mrf.mxu0  ;;  %vm819_vm5 = vcmp.lt.s32.totalorder %v1726_v44, 127  ;;  %v903_v2 = vsub.s32 6, %v1722_v39  ;;  %vm892_vm6 = vcmp.lt.s32.totalorder %v1726_v44, 113  ;;  %vm965_vm7 = vcmp.lt.s32.totalorder %v1726_v44, 112 }
  0xe1   : > { %544 = vrot.lane.b32.xlu0 %v1542_v38, %s1374_s18  ;;  %v1595_v57 = vmin.f32 %v445_v54, 6.0  ;;  %v437_v58 = vadd.f32 %v436_v55, %v1532_v24  ;;  %v446_v21 = vmax.f32 %v433_v16, 0.0  ;;  %v1744_v54 = vrot.slane %v1736_v51, %v494_v46 }
  0xe2   : > { %v438_v59 = vpop.f32.mrf.mxu0  ;;  %v1747_v55 = vrot.slane %v1741_v52, %v494_v46  ;;  %vm1038_vm8 = vcmp.lt.s32.totalorder %v1726_v44, 111 }
  0xe3   : > { %609 = vrot.lane.b32.xlu1 %v1540_v36, %s1375_s20  ;;  %v447_v60 = vmax.f32 %v437_v58, 0.0  ;;  %v439_v61 = vadd.f32 %v438_v59, %v1532_v24  ;;  %v1692_v25 = vmin.f32 %v446_v21, 6.0 }
  0xe5   : > { %538 = vrot.lane.b32.xlu0 %v1554_v42, %s1374_s18  ;;  %v1609_v63 = vmin.f32 %v447_v60, 6.0  ;;  %v448_v0 = vmax.f32 %v439_v61, 0.0 }
  0xe7   : > { %682 = vrot.lane.b32.xlu1 %v1540_v36, %s1376_s21  ;;  %2219 = vst [vmem:[#allocation4_spill] sm:$0xff] %v1609_v63  ;;  %v1619_v4 = vmin.f32 %v448_v0, 6.0  ;;  %v1757_v0 = vrot.slane %v1736_v51, %v563_v49 }
  0xe9   : > { %684 = vrot.lane.b32.xlu0 %v1554_v42, %s1376_s21 }
  0xeb   : > { %803 = vrot.lane.b32.xlu1 %v1540_v36, %s1377_s22 }
  0xed   : > { %878 = vrot.lane.b32.xlu0 %v1554_v42, %s1378_s23 }
  0xef   : > { %876 = vrot.lane.b32.xlu1 %v1540_v36, %s1378_s23 }
  0xf1   : > { %951 = vrot.lane.b32.xlu0 %v1554_v42, %s1379_s24 }
  0xf3   : > { %617 = vrot.lane.b32.xlu1 %v1542_v38, %s1375_s20 }
  0xf5   : > { %475 = vrot.lane.b32.xlu0 %v1578_v50, %s1373_s17 }
  0xf7   : > { %690 = vrot.lane.b32.xlu1 %v1542_v38, %s1376_s21 }
  0xf9   : > { %619 = vrot.lane.b32.xlu0 %v1578_v50, %s1375_s20 }
  0xfb   : > { %811 = vrot.lane.b32.xlu1 %v1542_v38, %s1377_s22 }
  0xfd   : > { %813 = vrot.lane.b32.xlu0 %v1578_v50, %s1377_s22 }
  0xff   : > { %884 = vrot.lane.b32.xlu1 %v1542_v38, %s1378_s23 }
 0x101   : > { %686 = vrot.lane.b32.xlu0 %v1595_v57, %s1376_s21 }
 0x103   : > { %467 = vrot.lane.b32.xlu1 %v1554_v42, %s1373_s17 }
 0x105   : > { %880 = vrot.lane.b32.xlu0 %v1595_v57, %s1378_s23 }
 0x107   : > { %611 = vrot.lane.b32.xlu1 %v1554_v42, %s1375_s20 }
 0x109   : > { %471 = vrot.lane.b32.xlu0 %v1609_v63, %s1373_s17 }
 0x10b   : > { %805 = vrot.lane.b32.xlu1 %v1554_v42, %s1377_s22 }
 0x10d   : > { %550 = vrot.lane.b32.xlu0 %v1619_v4, %s1374_s18 }
 0x10f   : > { %546 = vrot.lane.b32.xlu1 %v1578_v50, %s1374_s18 }
 0x111   : > { %817 = vrot.lane.b32.xlu0 %v1619_v4, %s1377_s22 }
 0x113   : > { %692 = vrot.lane.b32.xlu1 %v1578_v50, %s1376_s21 }
 0x115   : > { %963 = vrot.lane.b32.xlu0 %v1619_v4, %s1379_s24 }
 0x117   : > { %886 = vrot.lane.b32.xlu1 %v1578_v50, %s1378_s23 }
 0x119   : > { %1072 = vperm.xlu0 %1348, %v1476_v11   ;;  %v1664_v11 = vpop.permute.xlu1 %651 }
 0x11b   : > { %959 = vrot.lane.b32.xlu1 %v1578_v50, %s1379_s24 }
 0x11d   : > { %1068 = vperm.xlu0 %1348, %v1484_v13   ;;  %v1668_v13 = vpop.permute.xlu0 %930  ;;  %v1679_v19 = vpop.permute.xlu1 %780 }
 0x11e   : > { %2224 = vst [vmem:[#allocation9_spill] sm:$0xff] %v1668_v13 }
 0x11f   : > { %469 = vrot.lane.b32.xlu1 %v1595_v57, %s1373_s17 }
 0x121   : > { %957 = vrot.lane.b32.xlu0 %v1542_v38, %s1379_s24  ;;  %v1683_v20 = vpop.permute.xlu0 %926  ;;  %v1690_v24 = vpop.permute.xlu1 %776 }
 0x122   : > { %1351 = vset.pattern.permute.xlu0 %v2201_v1  ;;  %2225 = vst [vmem:[#allocation10_spill] sm:$0xff] %v1683_v20 }
 0x123   : > { %540 = vrot.lane.b32.xlu1 %v1595_v57, %s1374_s18 }
 0x125   : > { %1032 = vrot.lane.b32.xlu0 %v1578_v50, %s1380_s25  ;;  %v1694_v26 = vpop.permute.xlu0 %922  ;;  %v1698_v28 = vpop.permute.xlu1 %853 }
 0x126   : > { %2226 = vst [vmem:[#allocation11_spill] sm:$0xff] %v1698_v28 }
 0x127   : > { %613 = vrot.lane.b32.xlu1 %v1595_v57, %s1375_s20 }
 0x129   : > { %1111 = vperm.xlu0 %1351, %v1097_v15   ;;  %v1702_v29 = vpop.permute.xlu0 %918  ;;  %v1706_v30 = vpop.permute.xlu1 %1003  ;;  %v1760_v15 = vrot.slane %v1741_v52, %v563_v49 }
 0x12a   : > { %2227 = vst [vmem:[#allocation12_spill] sm:$0xff] %v1706_v30 }
 0x12b   : > { %807 = vrot.lane.b32.xlu1 %v1595_v57, %s1377_s22 }
 0x12d   : > { %1106 = vperm.xlu0 %1351, %v1096_v18   ;;  %v1708_v31 = vpop.permute.xlu0 %995  ;;  %v1712_v32 = vpop.permute.xlu1 %845 }
 0x12f   : > { %953 = vrot.lane.b32.xlu1 %v1595_v57, %s1379_s24 }
 0x131   : > { %1147 = vperm.xlu0 %1351, %v1144_v22   ;;  %v1716_v33 = vpop.permute.xlu0 %991  ;;  %v1720_v37 = vpop.permute.xlu1 %999 }
 0x132   : > { %2228 = vst [vmem:[#allocation13_spill] sm:$0xff] %v1716_v33  ;;  %2229 = vst [vmem:[#allocation14_spill] sm:$0xff] %v1720_v37 }
 0x133   : > { %477 = vrot.lane.b32.xlu1 %v1692_v25, %s1373_s17 }
 0x135   : > { %v1724_v41 = vpop.permute.xlu0 %1076 }
 0x136   : > { %2230 = vst [vmem:[#allocation15_spill] sm:$0xff] %v1724_v41 }
 0x137   : > { %548 = vrot.lane.b32.xlu1 %v1692_v25, %s1374_s18 }
 0x13b   : > { %621 = vrot.lane.b32.xlu1 %v1692_v25, %s1375_s20 }
 0x13f   : > { %694 = vrot.lane.b32.xlu1 %v1692_v25, %s1376_s21 }
 0x143   : > { %815 = vrot.lane.b32.xlu1 %v1692_v25, %s1377_s22 }
 0x147   : > { %888 = vrot.lane.b32.xlu1 %v1692_v25, %s1378_s23 }
 0x14b   : > { %961 = vrot.lane.b32.xlu1 %v1692_v25, %s1379_s24 }
 0x14d   : > { %v466_v47 = vpop.permute.xlu1 %465 }
 0x14f   : > { %v474_v58 = vpop.permute.xlu0 %473  ;;  %542 = vrot.lane.b32.xlu1 %v1609_v63, %s1374_s18 }
 0x150   : > { %v484_v59 = vsel %vm483_vm1, %v466_v47, %v474_v58  ;;  %v488_v60 = vsel %vm483_vm1, %v474_v58, %v466_v47 }
 0x151   : > { %v537_v61 = vpop.permute.xlu1 %536  ;;  %v500_v16 = vmul.f32 %v1744_v54, %v488_v60  ;;  %v501_v18 = vmul.f32 %v1747_v55, %v484_v59 }
 0x153   : > { %v545_v21 = vpop.permute.xlu0 %544  ;;  %615 = vrot.lane.b32.xlu1 %v1609_v63, %s1375_s20  ;;  %v528_v58 = vmul.f32 %v1645_v9, %v500_v16  ;;  %v529_v60 = vmul.f32 %v1645_v9, %v501_v18  ;;  %v636_v16 = vsub.s32 2, %v1722_v39  ;;  %v757_v9 = vsub.s32 4, %v1722_v39 }
 0x154   : > { %v553_v22 = vsel %vm552_vm2, %v537_v61, %v545_v21  ;;  %v557_v34 = vsel %vm552_vm2, %v545_v21, %v537_v61 }
 0x155   : > { %v569_v46 = vmul.f32 %v1757_v0, %v557_v34  ;;  %v570_v47 = vmul.f32 %v1760_v15, %v553_v22  ;;  %v610_v49 = vpop.permute.xlu1 %609  ;;  %v1793_v21 = vrot.slane %v1741_v52, %v636_v16  ;;  %v709_v22 = vsub.s32 3, %v1722_v39 }
 0x156   : > { %v1797_v34 = vrot.slane %v1736_v51, %v757_v9 }
 0x157   : > { %v593_v59 = vmul.f32 %v1566_v45, %v569_v46  ;;  %v594_v1 = vmul.f32 %v1566_v45, %v570_v47  ;;  %688 = vrot.lane.b32.xlu1 %v1609_v63, %s1376_s21  ;;  %v1784_v18 = vpop.permute.xlu0 %538  ;;  %v1800_v46 = vrot.slane %v1741_v52, %v757_v9  ;;  %v1815_v9 = vrot.slane %v1736_v51, %v709_v22 }
 0x158   : > { %v1818_v10 = vrot.slane %v1741_v52, %v709_v22  ;;  %v763_v12 = vmul.f32 %v1797_v34, %v1540_v36 }
 0x159   : > { %v601_v23 = vadd.f32 %v593_v59, %v528_v58  ;;  %v602_v33 = vadd.f32 %v594_v1, %v529_v60  ;;  %v683_v41 = vpop.permute.xlu1 %682  ;;  %v1790_v1 = vrot.slane %v1736_v51, %v636_v16  ;;  %v830_v58 = vsub.s32 5, %v1722_v39 }
 0x15a   : > { %v787_v37 = vmul.f32 %v1639_v8, %v763_v12  ;;  %v1857_v12 = vrot.slane %v1741_v52, %v903_v2 }
 0x15b   : > { %809 = vrot.lane.b32.xlu1 %v1609_v63, %s1377_s22  ;;  %v1803_v60 = vpop.permute.xlu0 %684  ;;  %v1835_v48 = vrot.slane %v1741_v52, %v830_v58 }
 0x15d   : > { %v804_v61 = vpop.permute.xlu1 %803 }
 0x15f   : > { %882 = vrot.lane.b32.xlu1 %v1609_v63, %s1378_s23  ;;  %v1843_v20 = vpop.permute.xlu0 %878 }
 0x161   : > { %v877_v45 = vpop.permute.xlu1 %876 }
 0x163   : > { %955 = vrot.lane.b32.xlu1 %v1609_v63, %s1379_s24 }
 0x165   : > { %v618_v47 = vpop.permute.xlu1 %617 }
 0x166   : > { %v626_v59 = vsel %vm625_vm3, %v610_v49, %v618_v47  ;;  %v630_v16 = vsel %vm625_vm3, %v618_v47, %v610_v49  ;;  %v764_v49 = vmul.f32 %v1800_v46, %v1542_v38 }
 0x167   : > { %v642_v30 = vmul.f32 %v1790_v1, %v630_v16  ;;  %v643_v13 = vmul.f32 %v1793_v21, %v626_v59  ;;  %1028 = vrot.lane.b32.xlu1 %v1609_v63, %s1380_s25  ;;  %v1828_v63 = vrot.slane %v1736_v51, %v830_v58 }
 0x169   : > { %v666_v47 = vmul.f32 %v1664_v11, %v642_v30  ;;  %v667_v16 = vmul.f32 %v1664_v11, %v643_v13  ;;  %v691_v59 = vpop.permute.xlu1 %690 }
 0x16a   : > { %v699_v22 = vsel %vm698_vm4, %v683_v41, %v691_v59  ;;  %v703_v7 = vsel %vm698_vm4, %v691_v59, %v683_v41  ;;  %v788_v41 = vmul.f32 %v1639_v8, %v764_v49 }
 0x16b   : > { %v674_v30 = vadd.f32 %v666_v47, %v601_v23  ;;  %v675_v27 = vadd.f32 %v667_v16, %v602_v33  ;;  %v715_v11 = vmul.f32 %v1815_v9, %v703_v7  ;;  %v716_v13 = vmul.f32 %v1818_v10, %v699_v22  ;;  %479 = vrot.lane.b32.xlu1 %v1619_v4, %s1373_s17 }
 0x16c   : > { %v1854_v33 = vrot.slane %v1736_v51, %v903_v2 }
 0x16d   : > { %v739_v58 = vmul.f32 %v1629_v6, %v715_v11  ;;  %v740_v59 = vmul.f32 %v1629_v6, %v716_v13  ;;  %v812_v28 = vpop.permute.xlu1 %811  ;;  %v1865_v13 = vpop.permute.xlu0 %951 }
 0x16e   : > { %v820_v23 = vsel %vm819_vm5, %v804_v61, %v812_v28  ;;  %v824_v7 = vsel %vm819_vm5, %v812_v28, %v804_v61 }
 0x16f   : > { %v747_v8 = vadd.f32 %v739_v58, %v674_v30  ;;  %v748_v49 = vadd.f32 %v740_v59, %v675_v27  ;;  %v836_v47 = vmul.f32 %v1828_v63, %v820_v23  ;;  %v837_v6 = vmul.f32 %v1835_v48, %v824_v7  ;;  %623 = vrot.lane.b32.xlu1 %v1619_v4, %s1375_s20 }
 0x171   : > { %v796_v16 = vadd.f32 %v788_v41, %v748_v49  ;;  %v795_v22 = vadd.f32 %v787_v37, %v747_v8  ;;  %v860_v11 = vmul.f32 %v1712_v32, %v836_v47  ;;  %v861_v28 = vmul.f32 %v1712_v32, %v837_v6  ;;  %v885_v61 = vpop.permute.xlu1 %884  ;;  %v476_v8 = vpop.permute.xlu0 %475 }
 0x172   : > { %v893_v2 = vsel %vm892_vm6, %v877_v45, %v885_v61  ;;  %v897_v27 = vsel %vm892_vm6, %v885_v61, %v877_v45 }
 0x173   : > { %v868_v30 = vadd.f32 %v860_v11, %v795_v22  ;;  %v869_v58 = vadd.f32 %v861_v28, %v796_v16  ;;  %v909_v59 = vmul.f32 %v1854_v33, %v893_v2  ;;  %v910_v41 = vmul.f32 %v1857_v12, %v897_v27  ;;  %696 = vrot.lane.b32.xlu1 %v1619_v4, %s1376_s21 }
 0x174   : > { %v765_v28 = vmul.f32 %v1797_v34, %v1554_v42 }
 0x175   : > { %v933_v32 = vmul.f32 %v1702_v29, %v909_v59  ;;  %v934_v37 = vmul.f32 %v1702_v29, %v910_v41  ;;  %v468_v23 = vpop.permute.xlu1 %467  ;;  %v620_v16 = vpop.permute.xlu0 %619 }
 0x176   : > { %v485_v47 = vsel %vm483_vm1, %v468_v23, %v476_v8  ;;  %v489_v6 = vsel %vm483_vm1, %v476_v8, %v468_v23  ;;  %v789_v8 = vmul.f32 %v1690_v24, %v765_v28 }
 0x177   : > { %890 = vrot.lane.b32.xlu1 %v1619_v4, %s1378_s23  ;;  %v1879_v7 = vadd.f32 %v934_v37, %v869_v58  ;;  %v1881_v45 = vadd.f32 %v933_v32, %v868_v30  ;;  %v502_v61 = vmul.f32 %v1744_v54, %v489_v6  ;;  %v503_v2 = vmul.f32 %v1747_v55, %v485_v47 }
 0x178   : > { %v766_v32 = vmul.f32 %v1800_v46, %v1578_v50  ;;  %v976_v50 = vsub.s32 7, %v1722_v39 }
 0x179   : > { %v612_v49 = vpop.permute.xlu1 %611  ;;  %v530_v47 = vmul.f32 %v1548_v40, %v502_v61  ;;  %v531_v6 = vmul.f32 %v1548_v40, %v503_v2 }
 0x17a   : > { %v627_v22 = vsel %vm625_vm3, %v612_v49, %v620_v16  ;;  %v631_v11 = vsel %vm625_vm3, %v620_v16, %v612_v49  ;;  %v814_v49 = vpop.permute.xlu0 %813 }
 0x17b   : > { %1026 = vrot.lane.b32.xlu1 %v1595_v57, %s1380_s25  ;;  %v644_v30 = vmul.f32 %v1790_v1, %v631_v11  ;;  %v645_v58 = vmul.f32 %v1793_v21, %v627_v22 }
 0x17d   : > { %v806_v29 = vpop.permute.xlu1 %805  ;;  %v668_v61 = vmul.f32 %v1593_v56, %v644_v30  ;;  %v669_v40 = vmul.f32 %v1593_v56, %v645_v58 }
 0x17e   : > { %v821_v16 = vsel %vm819_vm5, %v806_v29, %v814_v49  ;;  %v825_v22 = vsel %vm819_vm5, %v814_v49, %v806_v29 }
 0x17f   : > { %1036 = vrot.lane.b32.xlu1 %v1619_v4, %s1380_s25  ;;  %v838_v30 = vmul.f32 %v1828_v63, %v821_v16  ;;  %v839_v56 = vmul.f32 %v1835_v48, %v825_v22 }
 0x181   : > { %v547_v27 = vpop.permute.xlu1 %546 }
 0x182   : > { %v554_v59 = vsel %vm552_vm2, %v1784_v18, %v547_v27  ;;  %v558_v41 = vsel %vm552_vm2, %v547_v27, %v1784_v18  ;;  %v1098_v18 = vld [vmem:[%s2196_s4 + $0x18] sm:$0xff] }
 0x183   : > { %v571_v37 = vmul.f32 %v1757_v0, %v558_v41  ;;  %v572_v23 = vmul.f32 %v1760_v15, %v554_v59  ;;  %1034 = vrot.lane.b32.xlu1 %v1692_v25, %s1380_s25 }
 0x185   : > { %v595_v11 = vmul.f32 %v1558_v43, %v571_v37  ;;  %v596_v28 = vmul.f32 %v1558_v43, %v572_v23  ;;  %v693_v27 = vpop.permute.xlu1 %692  ;;  %v790_v43 = vmul.f32 %v1690_v24, %v766_v32  ;;  %v1949_v32 = vrot.slane %v1736_v51, %v976_v50 }
 0x186   : > { %v700_v2 = vsel %vm698_vm4, %v1803_v60, %v693_v27  ;;  %v704_v39 = vsel %vm698_vm4, %v693_v27, %v1803_v60  ;;  %v862_v27 = vmul.f32 %v1657_v14, %v838_v30 }
 0x187   : > { %v603_v59 = vadd.f32 %v595_v11, %v530_v47  ;;  %v604_v41 = vadd.f32 %v596_v28, %v531_v6  ;;  %v717_v29 = vmul.f32 %v1815_v9, %v704_v39  ;;  %v718_v37 = vmul.f32 %v1818_v10, %v700_v2  ;;  %1116 = vperm.xlu1 %1349, %v1098_v18  }
 0x188   : > { %v1952_v18 = vrot.slane %v1741_v52, %v976_v50  ;;  %v2231_v28 = vmov 8  }
 0x189   : > { %v676_v58 = vadd.f32 %v668_v61, %v603_v59  ;;  %v677_v23 = vadd.f32 %v669_v40, %v604_v41  ;;  %v741_v49 = vmul.f32 %v1617_v3, %v717_v29  ;;  %v742_v60 = vmul.f32 %v1617_v3, %v718_v37  ;;  %v887_v47 = vpop.permute.xlu1 %886 }
 0x18a   : > { %v894_v6 = vsel %vm892_vm6, %v1843_v20, %v887_v47  ;;  %v898_v24 = vsel %vm892_vm6, %v887_v47, %v1843_v20  ;;  %v863_v20 = vmul.f32 %v1657_v14, %v839_v56 }
 0x18b   : > { %v749_v16 = vadd.f32 %v741_v49, %v676_v58  ;;  %v750_v22 = vadd.f32 %v742_v60, %v677_v23  ;;  %v911_v11 = vmul.f32 %v1854_v33, %v894_v6  ;;  %v912_v3 = vmul.f32 %v1857_v12, %v898_v24  ;;  %949 = vrot.lane.b32.xlu1 %v1540_v36, %s1379_s24 }
 0x18c   : > { %1350 = vset.pattern.permute.xlu1 %v2231_v28  ;;  %v2232_v23 = vmov 0  }
 0x18d   : > { %v797_v51 = vadd.f32 %v789_v8, %v749_v16  ;;  %v798_v61 = vadd.f32 %v790_v43, %v750_v22  ;;  %v960_v40 = vpop.permute.xlu1 %959  ;;  %v935_v52 = vmul.f32 %v1694_v26, %v911_v11  ;;  %v936_v50 = vmul.f32 %v1694_v26, %v912_v3 }
 0x18e   : > { %v967_v2 = vsel %vm965_vm7, %v1865_v13, %v960_v40  ;;  %v971_v39 = vsel %vm965_vm7, %v960_v40, %v1865_v13 }
 0x18f   : > { %v870_v59 = vadd.f32 %v862_v27, %v797_v51  ;;  %v871_v41 = vadd.f32 %v863_v20, %v798_v61  ;;  %v984_v29 = vmul.f32 %v1949_v32, %v967_v2  ;;  %v985_v14 = vmul.f32 %v1952_v18, %v971_v39  ;;  %1024 = vrot.lane.b32.xlu1 %v1554_v42, %s1380_s25 }
 0x191   : > { %v943_v8 = vadd.f32 %v935_v52, %v870_v59  ;;  %v944_v37 = vadd.f32 %v936_v50, %v871_v41  ;;  %v1008_v26 = vmul.f32 %v1708_v31, %v984_v29  ;;  %v1009_v43 = vmul.f32 %v1708_v31, %v985_v14  ;;  %v470_v30 = vpop.permute.xlu1 %469  ;;  %v1095_v31 = vld [vmem:[%s2196_s4] sm:$0xff]  ;;  %v687_v41 = vpop.permute.xlu0 %686 }
 0x193   : > { %1064 = vperm.xlu1 %1350, %v1501_v17   ;;  %v1976_v56 = vadd.f32 %v1008_v26, %v943_v8  ;;  %v1978_v13 = vadd.f32 %v1009_v43, %v944_v37  ;;  %v767_v37 = vmul.f32 %v1797_v34, %v1595_v57  ;;  %v768_v26 = vmul.f32 %v1800_v46, %v1692_v25 }
 0x195   : > { %v541_v58 = vpop.permute.xlu1 %540 }
 0x197   : > { %1022 = vrot.lane.b32.xlu1 %v1540_v36, %s1380_s25 }
 0x198   : > { %1352 = vset.pattern.permute.xlu1 %v2232_v23 }
 0x199   : > { %v614_v42 = vpop.permute.xlu1 %613 }
 0x19b   : > { %1030 = vrot.lane.b32.xlu1 %v1542_v38, %s1380_s25 }
 0x19d   : > { %v808_v49 = vpop.permute.xlu1 %807 }
 0x19f   : > { %1101 = vperm.xlu1 %1352, %v1095_v31  }
 0x1a1   : > { %v954_v17 = vpop.permute.xlu1 %953 }
 0x1a5   : > { %v478_v60 = vpop.permute.xlu1 %477 }
 0x1a6   : > { %v486_v47 = vsel %vm483_vm1, %v470_v30, %v478_v60  ;;  %v490_v36 = vsel %vm483_vm1, %v478_v60, %v470_v30  ;;  %v791_v60 = vmul.f32 %v1679_v19, %v767_v37 }
 0x1a7   : > { %v504_v6 = vmul.f32 %v1744_v54, %v490_v36  ;;  %v505_v24 = vmul.f32 %v1747_v55, %v486_v47  ;;  %v792_v47 = vmul.f32 %v1679_v19, %v768_v26 }
 0x1a9   : > { %v549_v16 = vpop.permute.xlu1 %548  ;;  %v532_v28 = vmul.f32 %v1538_v35, %v504_v6  ;;  %v533_v27 = vmul.f32 %v1538_v35, %v505_v24 }
 0x1aa   : > { %v555_v38 = vsel %vm552_vm2, %v541_v58, %v549_v16  ;;  %v559_v22 = vsel %vm552_vm2, %v549_v16, %v541_v58 }
 0x1ab   : > { %v573_v11 = vmul.f32 %v1757_v0, %v559_v22  ;;  %v574_v3 = vmul.f32 %v1760_v15, %v555_v38  ;;  %v881_v38 = vpop.permute.xlu0 %880 }
 0x1ad   : > { %v597_v20 = vmul.f32 %v1625_v5, %v573_v11  ;;  %v598_v51 = vmul.f32 %v1625_v5, %v574_v3  ;;  %v622_v61 = vpop.permute.xlu1 %621  ;;  %v2233_v11 = vld [vmem:[#allocation11_spill] sm:$0xff] }
 0x1ae   : > { %v628_v40 = vsel %vm625_vm3, %v614_v42, %v622_v61  ;;  %v632_v52 = vsel %vm625_vm3, %v622_v61, %v614_v42 }
 0x1af   : > { %v605_v50 = vadd.f32 %v597_v20, %v532_v28  ;;  %v606_v2 = vadd.f32 %v598_v51, %v533_v27  ;;  %v646_v39 = vmul.f32 %v1790_v1, %v632_v52  ;;  %v647_v59 = vmul.f32 %v1793_v21, %v628_v40  ;;  %v2234_v52 = vld [vmem:[#allocation10_spill] sm:$0xff] }
 0x1b1   : > { %v670_v35 = vmul.f32 %v1585_v53, %v646_v39  ;;  %v671_v29 = vmul.f32 %v1585_v53, %v647_v59  ;;  %v695_v14 = vpop.permute.xlu1 %694 }
 0x1b2   : > { %v701_v5 = vsel %vm698_vm4, %v687_v41, %v695_v14  ;;  %v705_v8 = vsel %vm698_vm4, %v695_v14, %v687_v41 }
 0x1b3   : > { %v678_v43 = vadd.f32 %v670_v35, %v605_v50  ;;  %v679_v30 = vadd.f32 %v671_v29, %v606_v2  ;;  %v719_v58 = vmul.f32 %v1815_v9, %v705_v8  ;;  %v720_v23 = vmul.f32 %v1818_v10, %v701_v5  ;;  %v2235_v8 = vld [vmem:[#allocation14_spill] sm:$0xff] }
 0x1b5   : > { %v743_v53 = vmul.f32 %v1605_v62, %v719_v58  ;;  %v744_v42 = vmul.f32 %v1605_v62, %v720_v23  ;;  %v816_v31 = vpop.permute.xlu1 %815 }
 0x1b6   : > { %v822_v57 = vsel %vm819_vm5, %v808_v49, %v816_v31  ;;  %v826_v25 = vsel %vm819_vm5, %v816_v31, %v808_v49 }
 0x1b7   : > { %v751_v36 = vadd.f32 %v743_v53, %v678_v43  ;;  %v752_v6 = vadd.f32 %v744_v42, %v679_v30  ;;  %v840_v24 = vmul.f32 %v1828_v63, %v822_v57  ;;  %v841_v16 = vmul.f32 %v1835_v48, %v826_v25 }
 0x1b9   : > { %v799_v22 = vadd.f32 %v791_v60, %v751_v36  ;;  %v800_v62 = vadd.f32 %v792_v47, %v752_v6  ;;  %v864_v3 = vmul.f32 %v2233_v11, %v840_v24  ;;  %v865_v28 = vmul.f32 %v2233_v11, %v841_v16  ;;  %v889_v19 = vpop.permute.xlu1 %888 }
 0x1ba   : > { %v895_v27 = vsel %vm892_vm6, %v881_v38, %v889_v19  ;;  %v899_v49 = vsel %vm892_vm6, %v889_v19, %v881_v38 }
 0x1bb   : > { %v872_v20 = vadd.f32 %v864_v3, %v799_v22  ;;  %v873_v51 = vadd.f32 %v865_v28, %v800_v62  ;;  %v913_v61 = vmul.f32 %v1854_v33, %v895_v27  ;;  %v914_v40 = vmul.f32 %v1857_v12, %v899_v49 }
 0x1bd   : > { %v937_v50 = vmul.f32 %v2234_v52, %v913_v61  ;;  %v938_v2 = vmul.f32 %v2234_v52, %v914_v40  ;;  %v962_v39 = vpop.permute.xlu1 %961 }
 0x1be   : > { %v968_v59 = vsel %vm965_vm7, %v954_v17, %v962_v39  ;;  %v972_v41 = vsel %vm965_vm7, %v962_v39, %v954_v17  ;;  %v472_v17 = vpop.permute.xlu0 %471  ;;  %v2237_v39 = vld [vmem:[#allocation5_spill] sm:$0xff] }
 0x1bf   : > { %v986_v35 = vmul.f32 %v1949_v32, %v968_v59  ;;  %v987_v29 = vmul.f32 %v1952_v18, %v972_v41  ;;  %v945_v14 = vadd.f32 %v937_v50, %v872_v20  ;;  %v946_v5 = vadd.f32 %v938_v2, %v873_v51  ;;  %v2236_v50 = vld [vmem:[#allocation2_spill] sm:$0xff]  ;;  %v2238_v59 = vld [vmem:[#allocation3_spill] sm:$0xff] }
 0x1c1   : > { %v1010_v37 = vmul.f32 %v2235_v8, %v986_v35  ;;  %v1011_v26 = vmul.f32 %v2235_v8, %v987_v29  ;;  %v543_v43 = vpop.permute.xlu1 %542  ;;  %v2239_v8 = vld [vmem:[#allocation6_spill] sm:$0xff] }
 0x1c2   : > { %v551_v47 = vpop.permute.xlu0 %550 }
 0x1c3   : > { %v2050_v30 = vadd.f32 %v1010_v37, %v945_v14  ;;  %v2052_v58 = vadd.f32 %v1011_v26, %v946_v5  ;;  %v556_v38 = vsel %vm552_vm2, %v543_v43, %v551_v47  ;;  %v560_v22 = vsel %vm552_vm2, %v551_v47, %v543_v43  ;;  %v2240_v43 = vld [vmem:[#allocation4_spill] sm:$0xff] }
 0x1c4   : > { %v575_v27 = vmul.f32 %v1757_v0, %v560_v22  ;;  %v576_v49 = vmul.f32 %v1760_v15, %v556_v38  ;;  %v2241_v22 = vld [vmem:[#allocation8_spill] sm:$0xff] }
 0x1c5   : > { %v616_v23 = vpop.permute.xlu1 %615 }
 0x1c6   : > { %v818_v36 = vpop.permute.xlu0 %817 }
 0x1c9   : > { %v689_v53 = vpop.permute.xlu1 %688 }
 0x1ca   : > { %v964_v19 = vpop.permute.xlu0 %963 }
 0x1cd   : > { %v810_v42 = vpop.permute.xlu1 %809 }
 0x1ce   : > { %v1073_v15 = vpop.permute.xlu0 %1072 }
 0x1d1   : > { %v883_v31 = vpop.permute.xlu1 %882 }
 0x1d5   : > { %v956_v60 = vpop.permute.xlu1 %955 }
 0x1d9   : > { %v2054_v57 = vpop.permute.xlu1 %1028 }
 0x1dd   : > { %v480_v25 = vpop.permute.xlu1 %479 }
 0x1de   : > { %v487_v6 = vsel %vm483_vm1, %v472_v17, %v480_v25  ;;  %v491_v24 = vsel %vm483_vm1, %v480_v25, %v472_v17  ;;  %v770_v17 = vmul.f32 %v1800_v46, %v1619_v4  ;;  %v2094_v25 = vpop.permute.xlu0 %1068 }
 0x1df   : > { %v506_v3 = vmul.f32 %v1744_v54, %v491_v24  ;;  %v507_v28 = vmul.f32 %v1747_v55, %v487_v6  ;;  %v827_v6 = vsel %vm819_vm5, %v818_v36, %v810_v42 }
 0x1e1   : > { %v624_v16 = vpop.permute.xlu1 %623  ;;  %v534_v54 = vmul.f32 %v2236_v50, %v506_v3  ;;  %v535_v55 = vmul.f32 %v2236_v50, %v507_v28 }
 0x1e2   : > { %v629_v62 = vsel %vm625_vm3, %v616_v23, %v624_v16  ;;  %v633_v11 = vsel %vm625_vm3, %v624_v16, %v616_v23 }
 0x1e3   : > { %v648_v20 = vmul.f32 %v1790_v1, %v633_v11  ;;  %v649_v51 = vmul.f32 %v1793_v21, %v629_v62  ;;  %v599_v1 = vmul.f32 %v2237_v39, %v575_v27  ;;  %v600_v21 = vmul.f32 %v2237_v39, %v576_v49 }
 0x1e4   : > { %v794_v11 = vmul.f32 %v2241_v22, %v770_v17 }
 0x1e5   : > { %v697_v61 = vpop.permute.xlu1 %696  ;;  %v672_v41 = vmul.f32 %v2238_v59, %v648_v20  ;;  %v673_v35 = vmul.f32 %v2238_v59, %v649_v51  ;;  %v607_v14 = vadd.f32 %v599_v1, %v534_v54  ;;  %v608_v5 = vadd.f32 %v600_v21, %v535_v55  ;;  %v2243_v1 = vld [vmem:[#allocation9_spill] sm:$0xff] }
 0x1e6   : > { %v702_v40 = vsel %vm698_vm4, %v689_v53, %v697_v61  ;;  %v706_v52 = vsel %vm698_vm4, %v697_v61, %v689_v53  ;;  %v969_v20 = vsel %vm965_vm7, %v956_v60, %v964_v19  ;;  %v973_v51 = vsel %vm965_vm7, %v964_v19, %v956_v60 }
 0x1e7   : > { %v721_v2 = vmul.f32 %v1815_v9, %v706_v52  ;;  %v722_v0 = vmul.f32 %v1818_v10, %v702_v40  ;;  %v769_v9 = vmul.f32 %v1797_v34, %v2240_v43  ;;  %v823_v10 = vsel %vm819_vm5, %v810_v42, %v818_v36  ;;  %v2107_v42 = vpop.permute.xlu0 %957  ;;  %v2120_v40 = vld [vmem:[%s2197_s5 + $0x10] ss:$0 sm:$0xff] }
 0x1e8   : > { %v680_v23 = vadd.f32 %v672_v41, %v607_v14  ;;  %v681_v53 = vadd.f32 %v673_v35, %v608_v5  ;;  %v842_v38 = vmul.f32 %v1828_v63, %v823_v10  ;;  %v843_v34 = vmul.f32 %v1835_v48, %v827_v6  ;;  %v2242_v63 = vld [vmem:[#allocation7_spill] sm:$0xff] }
 0x1e9   : > { %v891_v29 = vpop.permute.xlu1 %890  ;;  %v745_v37 = vmul.f32 %v2239_v8, %v721_v2  ;;  %v746_v26 = vmul.f32 %v2239_v8, %v722_v0  ;;  %v793_v62 = vmul.f32 %v2241_v22, %v769_v9  ;;  %v988_v0 = vmul.f32 %v1949_v32, %v969_v20  ;;  %v2245_v9 = vld [vmem:[#allocation15_spill] sm:$0xff] }
 0x1ea   : > { %v896_v3 = vsel %vm892_vm6, %v883_v31, %v891_v29  ;;  %v900_v46 = vsel %vm892_vm6, %v891_v29, %v883_v31  ;;  %v866_v36 = vmul.f32 %v2242_v63, %v842_v38  ;;  %v867_v49 = vmul.f32 %v2242_v63, %v843_v34 }
 0x1eb   : > { %v753_v24 = vadd.f32 %v745_v37, %v680_v23  ;;  %v754_v16 = vadd.f32 %v746_v26, %v681_v53  ;;  %v915_v48 = vmul.f32 %v1854_v33, %v896_v3  ;;  %v916_v31 = vmul.f32 %v1857_v12, %v900_v46  ;;  %v2125_v33 = vld [vmem:[%s2197_s5 + $0x18] ss:$0 sm:$0xff]  ;;  %v1033_v29 = vpop.permute.xlu0 %1032  ;;  %v2244_v37 = vld [vmem:[#allocation12_spill] sm:$0xff] }
 0x1ec   : > { %v989_v39 = vmul.f32 %v1952_v18, %v973_v51  ;;  %v1012_v26 = vmul.f32 %v2244_v37, %v988_v0 }
 0x1ed   : > { %v1027_v47 = vpop.permute.xlu1 %1026  ;;  %v801_v28 = vadd.f32 %v793_v62, %v753_v24  ;;  %v802_v27 = vadd.f32 %v794_v11, %v754_v16  ;;  %v939_v21 = vmul.f32 %v2243_v1, %v915_v48 }
 0x1ee   : > { %v1013_v43 = vmul.f32 %v2244_v37, %v989_v39 }
 0x1ef   : > { %v874_v50 = vadd.f32 %v866_v36, %v801_v28  ;;  %v875_v54 = vadd.f32 %v867_v49, %v802_v27  ;;  %v1112_v17 = vpop.permute.xlu0 %1111 }
 0x1f1   : > { %v1037_v4 = vpop.permute.xlu1 %1036  ;;  %v947_v5 = vadd.f32 %v939_v21, %v874_v50 }
 0x1f2   : > { %v1042_v52 = vsel %vm1038_vm8, %v2054_v57, %v1037_v4  ;;  %v1046_v60 = vsel %vm1038_vm8, %v1037_v4, %v2054_v57  ;;  %v940_v57 = vmul.f32 %v2243_v1, %v916_v31 }
 0x1f3   : > { %v1061_v59 = vmul.f32 %v2120_v40, %v1042_v52  ;;  %v1062_v41 = vmul.f32 %v2125_v33, %v1046_v60  ;;  %v1020_v6 = vadd.f32 %v1012_v26, %v947_v5  ;;  %v1107_v50 = vpop.permute.xlu0 %1106 }
 0x1f4   : > { %v948_v8 = vadd.f32 %v940_v57, %v875_v54 }
 0x1f5   : > { %v1035_v61 = vpop.permute.xlu1 %1034  ;;  %v1085_v10 = vmul.f32 %v2245_v9, %v1061_v59  ;;  %v1086_v23 = vmul.f32 %v2245_v9, %v1062_v41  ;;  %v2246_v59 = vld [vmem:[#allocation13_spill] sm:$0xff] }
 0x1f6   : > { %v1041_v12 = vsel %vm1038_vm8, %v1027_v47, %v1035_v61  ;;  %v1045_v19 = vsel %vm1038_vm8, %v1035_v61, %v1027_v47  ;;  %v1021_v24 = vadd.f32 %v1013_v43, %v948_v8 }
 0x1f7   : > { %v1059_v55 = vmul.f32 %v2120_v40, %v1041_v12  ;;  %v1060_v2 = vmul.f32 %v2125_v33, %v1045_v19  ;;  %v1093_v38 = vadd.f32 %v1085_v10, %v1020_v6 }
 0x1f9   : > { %v1084_v35 = vmul.f32 %v1073_v15, %v1060_v2  ;;  %v1083_v14 = vmul.f32 %v1073_v15, %v1059_v55  ;;  %v1094_v15 = vadd.f32 %v1086_v23, %v1021_v24 }
 0x1fb   : > { %v1092_v53 = vadd.f32 %v1084_v35, %v2052_v58  ;;  %v1091_v47 = vadd.f32 %v1083_v14, %v2050_v30 }
 0x1fd   : > { %v1124_v16 = vadd.f32 %v1112_v17, %v1092_v53  ;;  %v1123_v34 = vadd.f32 %v1112_v17, %v1091_v47 }
 0x1ff   : > { %v1132_v3 = vmax.f32 %v1124_v16, 0.0  ;;  %v1131_v28 = vmax.f32 %v1123_v34, 0.0  ;;  %v1353_v16 = vld [vmem:[%s1456_s19] sm:$0xff]  ;;  %v1354_v34 = vld [vmem:[%s1456_s19 + $0x8] sm:$0xff] }
 0x201   : > { %v1140_v58 = vmin.f32 %v1132_v3, 6.0  ;;  %v1139_v48 = vmin.f32 %v1131_v28, 6.0 }
 0x202   : > { %v1117_v22 = vpop.permute.xlu1 %1116 }
 0x203   : > { %v1125_v62 = vadd.f32 %v1117_v22, %v1093_v38  ;;  %v1126_v11 = vadd.f32 %v1117_v22, %v1094_v15 }
 0x205   : > { %v1134_v4 = vmax.f32 %v1126_v11, 0.0  ;;  %v1133_v46 = vmax.f32 %v1125_v62, 0.0 }
 0x206   : > { %v950_v27 = vpop.permute.xlu1 %949 }
 0x207   : > { %v1142_v63 = vmin.f32 %v1134_v4, 6.0  ;;  %v1141_v36 = vmin.f32 %v1133_v46, 6.0  ;;  %v966_v12 = vsel %vm965_vm7, %v950_v27, %v2107_v42  ;;  %v970_v19 = vsel %vm965_vm7, %v2107_v42, %v950_v27 }
 0x208   : > { %v982_v2 = vmul.f32 %v1949_v32, %v966_v12  ;;  %v983_v0 = vmul.f32 %v1952_v18, %v970_v19 }
 0x209   : > { %1178 = vmatprep.subr.mxu1 %v1142_v63 }
 0x20a   : > { %1179 = vmatpush1.msra.mxu1 %v1141_v36  ;;  %v1025_v30 = vpop.permute.xlu1 %1024  ;;  %v1006_v41 = vmul.f32 %v2246_v59, %v982_v2  ;;  %v1007_v35 = vmul.f32 %v2246_v59, %v983_v0 }
 0x20b   : > { %v1040_v49 = vsel %vm1038_vm8, %v1025_v30, %v1033_v29  ;;  %v1044_v20 = vsel %vm1038_vm8, %v1033_v29, %v1025_v30  ;;  %1180 = vmatprep.subr.mxu1 %v1140_v58 }
 0x20c   : > { %v1057_v51 = vmul.f32 %v2120_v40, %v1040_v49  ;;  %v1058_v31 = vmul.f32 %v2125_v33, %v1044_v20  ;;  %1181 = vmatpush1.msra.mxu1 %v1139_v48  ;;  %v1015_v5 = vadd.f32 %v1007_v35, %v1879_v7  ;;  %v1014_v26 = vadd.f32 %v1006_v41, %v1881_v45  ;;  %v1143_v7 = vld [vmem:[%s2198_s6] sm:$0xff]  ;;  %v1148_v45 = vpop.permute.xlu0 %1147 }
 0x20e   : > { %v1081_v61 = vmul.f32 %v2094_v25, %v1057_v51  ;;  %v1082_v52 = vmul.f32 %v2094_v25, %v1058_v31  ;;  %v1065_v60 = vpop.permute.xlu1 %1064 }
 0x210   : > { %v1089_v54 = vadd.f32 %v1081_v61, %v1976_v56  ;;  %v1090_v55 = vadd.f32 %v1082_v52, %v1978_v13 }
 0x212   : > { %v1121_v39 = vadd.f32 %v1107_v50, %v1089_v54  ;;  %v1122_v25 = vadd.f32 %v1107_v50, %v1090_v55  ;;  %v1023_v1 = vpop.permute.xlu1 %1022 }
 0x214   : > { %v1129_v21 = vmax.f32 %v1121_v39, 0.0  ;;  %v1130_v57 = vmax.f32 %v1122_v25, 0.0 }
 0x216   : > { %v1137_v29 = vmin.f32 %v1129_v21, 6.0  ;;  %v1138_v42 = vmin.f32 %v1130_v57, 6.0  ;;  %v1031_v14 = vpop.permute.xlu1 %1030 }
 0x217   : > { %v1039_v56 = vsel %vm1038_vm8, %v1023_v1, %v1031_v14  ;;  %v1043_v32 = vsel %vm1038_vm8, %v1031_v14, %v1023_v1 }
 0x218   : > { %v1055_v18 = vmul.f32 %v2120_v40, %v1039_v56  ;;  %v1056_v13 = vmul.f32 %v2125_v33, %v1043_v32  ;;  %1182 = vmatprep.subr.mxu1 %v1138_v42 }
 0x219   : > { %1183 = vmatpush1.msra.mxu1 %v1137_v29 }
 0x21a   : > { %v1079_v8 = vmul.f32 %v1065_v60, %v1055_v18  ;;  %v1080_v37 = vmul.f32 %v1065_v60, %v1056_v13  ;;  %v1102_v43 = vpop.permute.xlu1 %1101 }
 0x21c   : > { %v1088_v9 = vadd.f32 %v1080_v37, %v1015_v5  ;;  %v1087_v10 = vadd.f32 %v1079_v8, %v1014_v26 }
 0x21e   : > { %v1119_v23 = vadd.f32 %v1102_v43, %v1087_v10  ;;  %v1120_v44 = vadd.f32 %v1102_v43, %v1088_v9 }
 0x220   : > { %v1127_v53 = vmax.f32 %v1119_v23, 0.0  ;;  %v1128_v17 = vmax.f32 %v1120_v44, 0.0 }
 0x222   : > { %v1135_v40 = vmin.f32 %v1127_v53, 6.0  ;;  %v1136_v33 = vmin.f32 %v1128_v17, 6.0 }
 0x224   : > { %1184 = vmatprep.subr.mxu1 %v1136_v33 }
 0x225   : > { %1185 = vmatpush1.msra.mxu1 %v1135_v40 }
 0x226   : > { %1300 = vmatmul.mubr.msk.f32.vlgmr.msra.gmra.mxu1 %vm1150_vm9, %v1143_v7 }
 0x2e6   : > { %v1220_v47 = vpop.f32.mrf.mxu1 }
 0x2e7   : > { %v1221_v6 = vadd.f32 %v1220_v47, %v1148_v45 }
 0x2e8   : > { %v1222_v24 = vpop.f32.mrf.mxu1 }
 0x2e9   : > { %v1225_v38 = vadd.f32 %v1353_v16, %v1221_v6  ;;  %v1223_v15 = vadd.f32 %v1222_v24, %v1148_v45 }
 0x2eb   : > { %1227 = vst [vmem:[%s307_s10] sm:$0xff] %v1225_v38  ;;  %v1226_v22 = vadd.f32 %v1354_v34, %v1223_v15 }
 0x2ed   : > { %1228 = vst [vmem:[%s307_s10 + $0x8] sm:$0xff] %v1226_v22 }
 0x2ee PF: > { %s18_s27 = sadd.s32 1, %s1361_s27  }
 0x2ef   : > { %p15_p4 = scmp.ge.s32.totalorder %s18_s27, 4  }
 0x2f1   :  { %17 = sbr.rel (!%p15_p4) target bundleno = 1 (0x1), region = 82 }

</bundles_post_ra>
